<compile_context>
chip_gen: v5e
topology: v5e:2x2
jax: 0.10.0
libtpu: 0.0.40
codegen_flags: <defaults>
</compile_context>

<pallas_src>
import numpy as np
import jax
import jax.numpy as jnp
from jax import lax
from jax.experimental import pallas as pl
from jax.experimental.pallas import tpu as pltpu

NEG_SLOPE = 0.01            # F.leaky_relu_ default
BN_EPS = 1e-5               # nn.BatchNorm2d default
MATMUL_DTYPE = jnp.float32  # jnp.bfloat16 for native-rate MXU (relax test tolerance)


def _mm(a, b):
    """MXU matmul with f32 accumulation."""
    return jnp.dot(a.astype(MATMUL_DTYPE), b.astype(MATMUL_DTYPE),
                   preferred_element_type=jnp.float32)


# ------------------------------ fused Pallas kernel ------------------------------

def _make_decoder_kernel(W):
    CENTER = 4  # 3x3 tap index (dr, ds) = (1, 1): zero spatial offset, no mask needed

    def kernel(xd_ref, lat_ref, wup_ref,
               s1u_ref, t1u_ref, s1l_ref, t1l_ref,
               w1_ref, s2_ref, t2_ref, w2_ref,
               wsu_ref, wsl_ref, bsc_ref, mask_ref,
               o_ref, up_scr, t1_scr, t2_scr):
        C = xd_ref.shape[0]
        C2 = 2 * C
        Cop = o_ref.shape[0]          # padded out-channels (multiple of 8)
        N = xd_ref.shape[1]           # lanes: (image, H, W) flattened, whole images only

        xd = xd_ref[...]              # (C, N) zero-dilated deconv input
        lat = lat_ref[...]            # (C, N) latent / skip input

        # ---- ConvTranspose2d(k=2, s=2): 4 tap rolls of the dilated input + ONE matmul.
        # Wrapped lanes always land on dilated zeros (odd rows/cols), so no masks.
        for k in range(4):
            ki, kj = divmod(k, 2)
            sh = ki * W + kj
            up_scr[pl.ds(k * C, C), :] = xd if sh == 0 else pltpu.roll(xd, sh, axis=1)
        up2d = _mm(wup_ref[...], up_scr[...])                          # (C, N)

        # ---- folded BN1 + LeakyReLU on both concat halves ---------------------------
        a_up = up2d * s1u_ref[...] + t1u_ref[...]
        a_up = jnp.maximum(a_up, NEG_SLOPE * a_up)
        a_lat = lat * s1l_ref[...] + t1l_ref[...]
        a_lat = jnp.maximum(a_lat, NEG_SLOPE * a_lat)

        # ---- conv1 (3x3, pad=1): stacked-tap scratch + ONE matmul -------------------
        # Materialize the concat once in the centre-tap row block, roll it for the rest;
        # boundary mask is folded into each scratch write.
        t1_scr[pl.ds(CENTER * C2, C), :] = a_up
        t1_scr[pl.ds(CENTER * C2 + C, C), :] = a_lat
        a_cat = t1_scr[pl.ds(CENTER * C2, C2), :]                      # (2C, N)
        for k in range(9):
            if k == CENTER:
                continue
            dr, ds = divmod(k, 3)
            sh = (-((dr - 1) * W + (ds - 1))) % N                      # static roll amount
            t1_scr[pl.ds(k * C2, C2), :] = pltpu.roll(a_cat, sh, axis=1) * mask_ref[k]
        h = _mm(w1_ref[...], t1_scr[...])                              # (Cop, N)

        # ---- folded BN2 + LeakyReLU, conv2 (3x3, pad=1) -----------------------------
        a2 = h * s2_ref[...] + t2_ref[...]
        a2 = jnp.maximum(a2, NEG_SLOPE * a2)
        t2_scr[pl.ds(CENTER * Cop, Cop), :] = a2
        for k in range(9):
            if k == CENTER:
                continue
            dr, ds = divmod(k, 3)
            sh = (-((dr - 1) * W + (ds - 1))) % N
            t2_scr[pl.ds(k * Cop, Cop), :] = pltpu.roll(a2, sh, axis=1) * mask_ref[k]
        h2 = _mm(w2_ref[...], t2_scr[...])                             # (Cop, N)

        # ---- shortcut (1x1 conv on the raw, un-normalized concat) + residual add ----
        sc = _mm(wsu_ref[...], up2d) + _mm(wsl_ref[...], lat) + bsc_ref[...]
        o_ref[...] = (sc + h2).astype(o_ref.dtype)                     # lane-dense store

    return kernel


# ------------------------------ host-side constants -------------------------------

def _boundary_masks(H, W, reps):
    """mask[dr*3+ds, 0, :] = 1 iff (r+dr-1, s+ds-1) lies inside the HxW image.
    Tiled `reps` times along lanes (one copy per image stacked in a lane block)."""
    m = np.zeros((9, 1, H * W), np.float32)
    r = np.arange(H)[:, None]
    s = np.arange(W)[None, :]
    for dr in range(3):
        for ds in range(3):
            valid = ((r + dr - 1 >= 0) & (r + dr - 1 < H) &
                     (s + ds - 1 >= 0) & (s + ds - 1 < W))
            m[dr * 3 + ds, 0] = valid.reshape(-1).astype(np.float32)
    return np.tile(m, (1, 1, reps))


def _fold_bn(gamma, beta, mean, var):
    inv = 1.0 / jnp.sqrt(var + BN_EPS)
    scale = gamma * inv
    shift = beta - mean * scale
    return scale.astype(jnp.float32), shift.astype(jnp.float32)


# ----------------------------------- wrapper ---------------------------------------

@jax.jit
def decoder_block_forward(params, x_nchw, latent_nchw):
    """Matches DecoderBlock.forward: x (B, C, T/2, F/2), latent (B, C, T, F), NCHW."""
    B, C, Hs, Ws = x_nchw.shape
    _, _, H, W = latent_nchw.shape
    assert H == 2 * Hs and W == 2 * Ws
    HW = H * W
    C2 = 2 * C
    Cout = params["conv1_w"].shape[0]
    Cop = -(-Cout // 8) * 8                       # pad Cout up to a full 8-sublane tile

    # Lane blocking: split the batch into G blocks of whole images.  G=2 keeps both v7x
    # TensorCores busy; on single-TC v5e/v6e the 2nd step is just ~0.35us of overhead.
    G = 2 if (B % 2 == 0 and B >= 2) else 1
    Bb = B // G
    Nb = Bb * HW

    f32 = jnp.float32
    # ---- activations: channel-major, batch stacked on the 128-lane axis -------------
    # Zero-dilate x (values at even (r, s)) so the transposed conv becomes 4 lane rolls.
    x_dil = jnp.zeros((B, C, H, W), f32).at[:, :, ::2, ::2].set(x_nchw.astype(f32))
    xd2 = x_dil.transpose(1, 0, 2, 3).reshape(C, B * HW)
    lat2 = latent_nchw.astype(f32).transpose(1, 0, 2, 3).reshape(C, B * HW)

    # ---- stacked-tap weight layouts matching the kernel scratch row ordering --------
    # deconv: wup[d, k*C + c] = W_ct2d[c, d, ki, kj], k = ki*2 + kj
    wup = jnp.transpose(params["upsample_w"], (1, 2, 3, 0)).reshape(C, 4 * C).astype(f32)

    s1, t1 = _fold_bn(*params["bn1"])
    s1u, t1u = s1[:C].reshape(C, 1), t1[:C].reshape(C, 1)
    s1l, t1l = s1[C:].reshape(C, 1), t1[C:].reshape(C, 1)

    # conv1: w1[o, k*2C + c] = conv1_w[o, c, dr, ds], k = dr*3 + ds; rows padded to Cop
    w1 = jnp.transpose(params["conv1_w"], (0, 2, 3, 1)).reshape(Cout, 9 * C2).astype(f32)
    w1 = jnp.zeros((Cop, 9 * C2), f32).at[:Cout].set(w1)

    s2, t2 = _fold_bn(*params["bn2"])
    s2p = jnp.zeros((Cop, 1), f32).at[:Cout, 0].set(s2)
    t2p = jnp.zeros((Cop, 1), f32).at[:Cout, 0].set(t2)

    w2f = jnp.zeros((Cop, Cop, 3, 3), f32).at[:Cout, :Cout].set(params["conv2_w"].astype(f32))
    w2 = jnp.transpose(w2f, (0, 2, 3, 1)).reshape(Cop, 9 * Cop)

    if C2 != Cout:                                 # ConvBlock shortcut conv (1x1)
        wsc = params["shortcut_w"][:, :, 0, 0].astype(f32)
        bsc = params["shortcut_b"].astype(f32)
    else:                                          # identity residual path
        wsc = jnp.eye(C2, dtype=f32)
        bsc = jnp.zeros((Cout,), f32)
    wscp = jnp.zeros((Cop, C2), f32).at[:Cout].set(wsc)
    bscp = jnp.zeros((Cop, 1), f32).at[:Cout, 0].set(bsc)
    wsu, wsl = wscp[:, :C], wscp[:, C:]

    masks = jnp.asarray(_boundary_masks(H, W, Bb))                     # (9, 1, Nb)

    # ---- cost estimate + VMEM budget (computed from actual buffer sizes) ------------
    macs = B * HW * (4 * C * C + 9 * Cop * C2 + 9 * Cop * Cop + Cop * C2)
    const_bytes = 4 * int(wup.size + w1.size + w2.size + wscp.size + masks.size
                          + 4 * C + 3 * Cop)
    act_bytes = 4 * Nb * (2 * C + Cop)
    scratch_bytes = 4 * Nb * (4 * C + 9 * C2 + 9 * Cop)
    cost = pl.CostEstimate(
        flops=2 * macs, transcendentals=0,
        bytes_accessed=4 * int(xd2.size + lat2.size) + 4 * Cop * B * HW + const_bytes)
    # double-buffered activations/constants + scratch, with headroom; capped at 32 MiB
    # so the limit is valid on v7x (64 MiB phys) as well as v5e/v6e (128 MiB).
    vmem_bytes = int(min(max(4 * (act_bytes + const_bytes) + 2 * scratch_bytes,
                             16 << 20), 32 << 20))

    def lane_spec(rows):
        return pl.BlockSpec((rows, Nb), lambda g: (0, g))

    def const_spec(shape):
        zeros = (0,) * len(shape)
        return pl.BlockSpec(shape, lambda g, _z=zeros: _z)

    # TODO(synk): for very large channel counts, single-buffer the constant operands
    # (pipeline_mode=pl.Buffered(1)); at these sizes the duplicate buffer is a few KiB.
    out2 = pl.pallas_call(
        _make_decoder_kernel(W),
        out_shape=jax.ShapeDtypeStruct((Cop, B * HW), f32),
        grid=(G,),
        in_specs=[
            lane_spec(C),                      # zero-dilated x
            lane_spec(C),                      # latent
            const_spec((C, 4 * C)),            # deconv weights (stacked taps)
            const_spec((C, 1)), const_spec((C, 1)),      # bn1 scale/shift (up half)
            const_spec((C, 1)), const_spec((C, 1)),      # bn1 scale/shift (latent half)
            const_spec((Cop, 9 * C2)),         # conv1 weights (stacked taps, padded)
            const_spec((Cop, 1)), const_spec((Cop, 1)),  # bn2 scale/shift (padded)
            const_spec((Cop, 9 * Cop)),        # conv2 weights (stacked taps, padded)
            const_spec((Cop, C)), const_spec((Cop, C)),  # shortcut weights (split halves)
            const_spec((Cop, 1)),              # shortcut bias (padded)
            const_spec((9, 1, Nb)),            # 3x3 boundary masks (tiled per image)
        ],
        out_specs=lane_spec(Cop),
        scratch_shapes=[
            pltpu.VMEM((4 * C, Nb), f32),      # stacked deconv taps
            pltpu.VMEM((9 * C2, Nb), f32),     # stacked conv1 taps
            pltpu.VMEM((9 * Cop, Nb), f32),    # stacked conv2 taps
        ],
        compiler_params=pltpu.CompilerParams(
            dimension_semantics=("parallel",),
            vmem_limit_bytes=vmem_bytes),
        cost_estimate=cost,
    )(xd2, lat2, wup, s1u, t1u, s1l, t1l, w1, s2p, t2p, w2, wsu, wsl, bscp, masks)

    # TODO(synk): for large spectrograms, tile H*W with overlapping (halo) row blocks and
    # per-tile masks -- the image-global masks are only valid for whole-image lane blocks.
    out = out2.reshape(Cop, B, H, W).transpose(1, 0, 2, 3)
    return out[:, :Cout]


# ----------------------- deterministic parameter init ------------------------------

def init_params(key, in_channels, out_channels):
    C, Co = in_channels, out_channels
    cin = 2 * C
    ks = jax.random.split(key, 12)
    return {
        "upsample_w": 0.1 * jax.random.normal(ks[0], (C, C, 2, 2), jnp.float32),
        "conv1_w":    0.1 * jax.random.normal(ks[1], (Co, cin, 3, 3), jnp.float32),
        "conv2_w":    0.1 * jax.random.normal(ks[2], (Co, Co, 3, 3), jnp.float32),
        "bn1": (1.0 + 0.1 * jax.random.normal(ks[3], (cin,), jnp.float32),
                0.1 * jax.random.normal(ks[4], (cin,), jnp.float32),
                0.1 * jax.random.normal(ks[5], (cin,), jnp.float32),
                1.0 + 0.1 * jnp.abs(jax.random.normal(ks[6], (cin,), jnp.float32))),
        "bn2": (1.0 + 0.1 * jax.random.normal(ks[7], (Co,), jnp.float32),
                0.1 * jax.random.normal(ks[8], (Co,), jnp.float32),
                0.1 * jax.random.normal(ks[9], (Co,), jnp.float32),
                1.0 + 0.1 * jnp.abs(jax.random.normal(ks[10], (Co,), jnp.float32))),
        "shortcut_w": 0.1 * jax.random.normal(ks[11], (Co, cin, 1, 1), jnp.float32),
        "shortcut_b": 0.01 * jnp.arange(Co, dtype=jnp.float32),
    }


# ------------------------------ pure-JAX reference ---------------------------------

def _bn_eval(x, gamma, beta, mean, var):
    return ((x - mean[None, :, None, None]) / jnp.sqrt(var + BN_EPS)[None, :, None, None]
            * gamma[None, :, None, None] + beta[None, :, None, None])


def _lrelu(x):
    return jnp.where(x > 0, x, NEG_SLOPE * x)


def ref_forward(params, x, latent):
    wt = params["upsample_w"]
    B, C, Hs, Ws = x.shape
    up = jnp.einsum("bcij,cdkl->bdikjl", x, wt).reshape(B, C, 2 * Hs, 2 * Ws)
    cat = jnp.concatenate([up, latent], axis=1)
    dn = ("NCHW", "OIHW", "NCHW")
    a1 = _lrelu(_bn_eval(cat, *params["bn1"]))
    h = lax.conv_general_dilated(a1, params["conv1_w"], (1, 1), ((1, 1), (1, 1)),
                                 dimension_numbers=dn)
    a2 = _lrelu(_bn_eval(h, *params["bn2"]))
    h = lax.conv_general_dilated(a2, params["conv2_w"], (1, 1), ((1, 1), (1, 1)),
                                 dimension_numbers=dn)
    if cat.shape[1] == h.shape[1]:
        return cat + h
    sc = lax.conv_general_dilated(cat, params["shortcut_w"], (1, 1), ((0, 0), (0, 0)),
                                  dimension_numbers=dn)
    return sc + params["shortcut_b"][None, :, None, None] + h


# ------------------------------------- main -----------------------------------------

if __name__ == "__main__":
    B, C_in, C_out = 2, 4, 6
    T, F = 16, 16

    key = jax.random.PRNGKey(0)
    k_p, k_x, k_l = jax.random.split(key, 3)
    params = init_params(k_p, C_in, C_out)
    x = jax.random.normal(k_x, (B, C_in, T // 2, F // 2), jnp.float32)
    latent = jax.random.normal(k_l, (B, C_in, T, F), jnp.float32)

    out = jax.block_until_ready(decoder_block_forward(params, x, latent))
    assert out.shape == (B, C_out, T, F)

    ref = jax.block_until_ready(ref_forward(params, x, latent))
    np.testing.assert_allclose(np.asarray(out), np.asarray(ref), rtol=1e-4, atol=1e-4)

    print("KERNEL_OK")
</pallas_src>

<mosaic_0001>
module attributes {stable_mosaic.version = 11 : i64} {
  func.func @kernel(%arg0: i32, %arg1: memref<4x256xf32, #tpu.memory_space<vmem>>, %arg2: memref<4x256xf32, #tpu.memory_space<vmem>>, %arg3: memref<4x16xf32, #tpu.memory_space<vmem>>, %arg4: memref<4x1xf32, #tpu.memory_space<vmem>>, %arg5: memref<4x1xf32, #tpu.memory_space<vmem>>, %arg6: memref<4x1xf32, #tpu.memory_space<vmem>>, %arg7: memref<4x1xf32, #tpu.memory_space<vmem>>, %arg8: memref<8x72xf32, #tpu.memory_space<vmem>>, %arg9: memref<8x1xf32, #tpu.memory_space<vmem>>, %arg10: memref<8x1xf32, #tpu.memory_space<vmem>>, %arg11: memref<8x72xf32, #tpu.memory_space<vmem>>, %arg12: memref<8x4xf32, #tpu.memory_space<vmem>>, %arg13: memref<8x4xf32, #tpu.memory_space<vmem>>, %arg14: memref<8x1xf32, #tpu.memory_space<vmem>>, %arg15: memref<9x1x256xf32, #tpu.memory_space<vmem>>, %arg16: memref<8x256xf32, #tpu.memory_space<vmem>>, %arg17: memref<16x256xf32, #tpu.memory_space<vmem>>, %arg18: memref<72x256xf32, #tpu.memory_space<vmem>>, %arg19: memref<72x256xf32, #tpu.memory_space<vmem>>) attributes {dimension_semantics = [#tpu.dimension_semantics<parallel>], iteration_bounds = array<i64: 2>, scalar_prefetch = 0 : i64, scratch_operands = 3 : i64, tpu.core_type = #tpu.core_type<tc>, window_params = [{transform_indices = @transform_0, window_bounds = array<i64: 4, 256>}, {transform_indices = @transform_1, window_bounds = array<i64: 4, 256>}, {pipeline_mode = #tpu.pipeline_mode<synchronous>, transform_indices = @transform_2, window_bounds = array<i64: 4, 16>}, {pipeline_mode = #tpu.pipeline_mode<synchronous>, transform_indices = @transform_3, window_bounds = array<i64: 4, 1>}, {pipeline_mode = #tpu.pipeline_mode<synchronous>, transform_indices = @transform_4, window_bounds = array<i64: 4, 1>}, {pipeline_mode = #tpu.pipeline_mode<synchronous>, transform_indices = @transform_5, window_bounds = array<i64: 4, 1>}, {pipeline_mode = #tpu.pipeline_mode<synchronous>, transform_indices = @transform_6, window_bounds = array<i64: 4, 1>}, {pipeline_mode = #tpu.pipeline_mode<synchronous>, transform_indices = @transform_7, window_bounds = array<i64: 8, 72>}, {pipeline_mode = #tpu.pipeline_mode<synchronous>, transform_indices = @transform_8, window_bounds = array<i64: 8, 1>}, {pipeline_mode = #tpu.pipeline_mode<synchronous>, transform_indices = @transform_9, window_bounds = array<i64: 8, 1>}, {pipeline_mode = #tpu.pipeline_mode<synchronous>, transform_indices = @transform_10, window_bounds = array<i64: 8, 72>}, {pipeline_mode = #tpu.pipeline_mode<synchronous>, transform_indices = @transform_11, window_bounds = array<i64: 8, 4>}, {pipeline_mode = #tpu.pipeline_mode<synchronous>, transform_indices = @transform_12, window_bounds = array<i64: 8, 4>}, {pipeline_mode = #tpu.pipeline_mode<synchronous>, transform_indices = @transform_13, window_bounds = array<i64: 8, 1>}, {pipeline_mode = #tpu.pipeline_mode<synchronous>, transform_indices = @transform_14, window_bounds = array<i64: 9, 1, 256>}, {transform_indices = @transform_15, window_bounds = array<i64: 8, 256>}]} {
    %c0 = arith.constant 0 : index
    %c0_0 = arith.constant 0 : index
    %0 = vector.load %arg1[%c0, %c0_0] : memref<4x256xf32, #tpu.memory_space<vmem>>, vector<4x256xf32>
    %c0_1 = arith.constant 0 : index
    %c0_2 = arith.constant 0 : index
    %1 = vector.load %arg2[%c0_1, %c0_2] : memref<4x256xf32, #tpu.memory_space<vmem>>, vector<4x256xf32>
    %c0_3 = arith.constant 0 : index
    %c0_4 = arith.constant 0 : index
    %2 = vector.load %arg17[%c0_3, %c0_4] : memref<16x256xf32, #tpu.memory_space<vmem>>, vector<4x256xf32>
    tpu.vector_store %arg17[%c0_3, %c0_4], %0 {strides = array<i32>} : memref<16x256xf32, #tpu.memory_space<vmem>>, vector<4x256xf32>,
    %c1_i32 = arith.constant 1 : i32
    %3 = tpu.dynamic_rotate %0 by %c1_i32 dim 1 : vector<4x256xf32>, i32 -> vector<4x256xf32>
    %c4 = arith.constant 4 : index
    %c0_5 = arith.constant 0 : index
    %4 = vector.load %arg17[%c4, %c0_5] : memref<16x256xf32, #tpu.memory_space<vmem>>, vector<4x256xf32>
    tpu.vector_store %arg17[%c4, %c0_5], %3 {strides = array<i32>} : memref<16x256xf32, #tpu.memory_space<vmem>>, vector<4x256xf32>,
    %c16_i32 = arith.constant 16 : i32
    %5 = tpu.dynamic_rotate %0 by %c16_i32 dim 1 : vector<4x256xf32>, i32 -> vector<4x256xf32>
    %c8 = arith.constant 8 : index
    %c0_6 = arith.constant 0 : index
    %6 = vector.load %arg17[%c8, %c0_6] : memref<16x256xf32, #tpu.memory_space<vmem>>, vector<4x256xf32>
    tpu.vector_store %arg17[%c8, %c0_6], %5 {strides = array<i32>} : memref<16x256xf32, #tpu.memory_space<vmem>>, vector<4x256xf32>,
    %c17_i32 = arith.constant 17 : i32
    %7 = tpu.dynamic_rotate %0 by %c17_i32 dim 1 : vector<4x256xf32>, i32 -> vector<4x256xf32>
    %c12 = arith.constant 12 : index
    %c0_7 = arith.constant 0 : index
    %8 = vector.load %arg17[%c12, %c0_7] : memref<16x256xf32, #tpu.memory_space<vmem>>, vector<4x256xf32>
    tpu.vector_store %arg17[%c12, %c0_7], %7 {strides = array<i32>} : memref<16x256xf32, #tpu.memory_space<vmem>>, vector<4x256xf32>,
    %c0_8 = arith.constant 0 : index
    %c0_9 = arith.constant 0 : index
    %9 = vector.load %arg3[%c0_8, %c0_9] : memref<4x16xf32, #tpu.memory_space<vmem>>, vector<4x16xf32>
    %c0_10 = arith.constant 0 : index
    %c0_11 = arith.constant 0 : index
    %10 = vector.load %arg17[%c0_10, %c0_11] : memref<16x256xf32, #tpu.memory_space<vmem>>, vector<16x256xf32>
    %cst = arith.constant dense<0.000000e+00> : vector<4x256xf32>
    %11 = tpu.matmul %9, %10, %cst {dimension_numbers = #tpu.dot_dimension_numbers<[1], [0], [0], [1], [0, 0, 1, 1], [], []>} : vector<4x16xf32>, vector<16x256xf32>, vector<4x256xf32> -> vector<4x256xf32>
    %c0_12 = arith.constant 0 : index
    %c0_13 = arith.constant 0 : index
    %12 = vector.load %arg4[%c0_12, %c0_13] : memref<4x1xf32, #tpu.memory_space<vmem>>, vector<4x1xf32>
    %13 = vector.broadcast %12 : vector<4x1xf32> to vector<4x256xf32>
    %14 = arith.mulf %11, %13 : vector<4x256xf32>
    %c0_14 = arith.constant 0 : index
    %c0_15 = arith.constant 0 : index
    %15 = vector.load %arg5[%c0_14, %c0_15] : memref<4x1xf32, #tpu.memory_space<vmem>>, vector<4x1xf32>
    %16 = vector.broadcast %15 : vector<4x1xf32> to vector<4x256xf32>
    %17 = arith.addf %14, %16 : vector<4x256xf32>
    %cst_16 = arith.constant 0.00999999977 : f32
    %18 = vector.broadcast %cst_16 : f32 to vector<4x256xf32>
    %19 = arith.mulf %18, %17 : vector<4x256xf32>
    %20 = arith.maximumf %17, %19 : vector<4x256xf32>
    %c0_17 = arith.constant 0 : index
    %c0_18 = arith.constant 0 : index
    %21 = vector.load %arg6[%c0_17, %c0_18] : memref<4x1xf32, #tpu.memory_space<vmem>>, vector<4x1xf32>
    %22 = vector.broadcast %21 : vector<4x1xf32> to vector<4x256xf32>
    %23 = arith.mulf %1, %22 : vector<4x256xf32>
    %c0_19 = arith.constant 0 : index
    %c0_20 = arith.constant 0 : index
    %24 = vector.load %arg7[%c0_19, %c0_20] : memref<4x1xf32, #tpu.memory_space<vmem>>, vector<4x1xf32>
    %25 = vector.broadcast %24 : vector<4x1xf32> to vector<4x256xf32>
    %26 = arith.addf %23, %25 : vector<4x256xf32>
    %cst_21 = arith.constant 0.00999999977 : f32
    %27 = vector.broadcast %cst_21 : f32 to vector<4x256xf32>
    %28 = arith.mulf %27, %26 : vector<4x256xf32>
    %29 = arith.maximumf %26, %28 : vector<4x256xf32>
    %c32 = arith.constant 32 : index
    %c0_22 = arith.constant 0 : index
    %30 = vector.load %arg18[%c32, %c0_22] : memref<72x256xf32, #tpu.memory_space<vmem>>, vector<4x256xf32>
    tpu.vector_store %arg18[%c32, %c0_22], %20 {strides = array<i32>} : memref<72x256xf32, #tpu.memory_space<vmem>>, vector<4x256xf32>,
    %c36 = arith.constant 36 : index
    %c0_23 = arith.constant 0 : index
    %31 = vector.load %arg18[%c36, %c0_23] : memref<72x256xf32, #tpu.memory_space<vmem>>, vector<4x256xf32>
    tpu.vector_store %arg18[%c36, %c0_23], %29 {strides = array<i32>} : memref<72x256xf32, #tpu.memory_space<vmem>>, vector<4x256xf32>,
    %c32_24 = arith.constant 32 : index
    %c0_25 = arith.constant 0 : index
    %32 = vector.load %arg18[%c32_24, %c0_25] : memref<72x256xf32, #tpu.memory_space<vmem>>, vector<8x256xf32>
    %c17_i32_26 = arith.constant 17 : i32
    %33 = tpu.dynamic_rotate %32 by %c17_i32_26 dim 1 : vector<8x256xf32>, i32 -> vector<8x256xf32>
    %c0_27 = arith.constant 0 : index
    %c0_28 = arith.constant 0 : index
    %c0_29 = arith.constant 0 : index
    %34 = vector.load %arg15[%c0_27, %c0_28, %c0_29] : memref<9x1x256xf32, #tpu.memory_space<vmem>>, vector<1x1x256xf32>
    %35 = vector.shape_cast %34 : vector<1x1x256xf32> to vector<1x256xf32>
    %36 = vector.broadcast %35 : vector<1x256xf32> to vector<8x256xf32>
    %37 = arith.mulf %33, %36 : vector<8x256xf32>
    %c0_30 = arith.constant 0 : index
    %c0_31 = arith.constant 0 : index
    %38 = vector.load %arg18[%c0_30, %c0_31] : memref<72x256xf32, #tpu.memory_space<vmem>>, vector<8x256xf32>
    tpu.vector_store %arg18[%c0_30, %c0_31], %37 {strides = array<i32>} : memref<72x256xf32, #tpu.memory_space<vmem>>, vector<8x256xf32>,
    %c16_i32_32 = arith.constant 16 : i32
    %39 = tpu.dynamic_rotate %32 by %c16_i32_32 dim 1 : vector<8x256xf32>, i32 -> vector<8x256xf32>
    %c1 = arith.constant 1 : index
    %c0_33 = arith.constant 0 : index
    %c0_34 = arith.constant 0 : index
    %40 = vector.load %arg15[%c1, %c0_33, %c0_34] : memref<9x1x256xf32, #tpu.memory_space<vmem>>, vector<1x1x256xf32>
    %41 = vector.shape_cast %40 : vector<1x1x256xf32> to vector<1x256xf32>
    %42 = vector.broadcast %41 : vector<1x256xf32> to vector<8x256xf32>
    %43 = arith.mulf %39, %42 : vector<8x256xf32>
    %c8_35 = arith.constant 8 : index
    %c0_36 = arith.constant 0 : index
    %44 = vector.load %arg18[%c8_35, %c0_36] : memref<72x256xf32, #tpu.memory_space<vmem>>, vector<8x256xf32>
    tpu.vector_store %arg18[%c8_35, %c0_36], %43 {strides = array<i32>} : memref<72x256xf32, #tpu.memory_space<vmem>>, vector<8x256xf32>,
    %c15_i32 = arith.constant 15 : i32
    %45 = tpu.dynamic_rotate %32 by %c15_i32 dim 1 : vector<8x256xf32>, i32 -> vector<8x256xf32>
    %c2 = arith.constant 2 : index
    %c0_37 = arith.constant 0 : index
    %c0_38 = arith.constant 0 : index
    %46 = vector.load %arg15[%c2, %c0_37, %c0_38] : memref<9x1x256xf32, #tpu.memory_space<vmem>>, vector<1x1x256xf32>
    %47 = vector.shape_cast %46 : vector<1x1x256xf32> to vector<1x256xf32>
    %48 = vector.broadcast %47 : vector<1x256xf32> to vector<8x256xf32>
    %49 = arith.mulf %45, %48 : vector<8x256xf32>
    %c16 = arith.constant 16 : index
    %c0_39 = arith.constant 0 : index
    %50 = vector.load %arg18[%c16, %c0_39] : memref<72x256xf32, #tpu.memory_space<vmem>>, vector<8x256xf32>
    tpu.vector_store %arg18[%c16, %c0_39], %49 {strides = array<i32>} : memref<72x256xf32, #tpu.memory_space<vmem>>, vector<8x256xf32>,
    %c1_i32_40 = arith.constant 1 : i32
    %51 = tpu.dynamic_rotate %32 by %c1_i32_40 dim 1 : vector<8x256xf32>, i32 -> vector<8x256xf32>
    %c3 = arith.constant 3 : index
    %c0_41 = arith.constant 0 : index
    %c0_42 = arith.constant 0 : index
    %52 = vector.load %arg15[%c3, %c0_41, %c0_42] : memref<9x1x256xf32, #tpu.memory_space<vmem>>, vector<1x1x256xf32>
    %53 = vector.shape_cast %52 : vector<1x1x256xf32> to vector<1x256xf32>
    %54 = vector.broadcast %53 : vector<1x256xf32> to vector<8x256xf32>
    %55 = arith.mulf %51, %54 : vector<8x256xf32>
    %c24 = arith.constant 24 : index
    %c0_43 = arith.constant 0 : index
    %56 = vector.load %arg18[%c24, %c0_43] : memref<72x256xf32, #tpu.memory_space<vmem>>, vector<8x256xf32>
    tpu.vector_store %arg18[%c24, %c0_43], %55 {strides = array<i32>} : memref<72x256xf32, #tpu.memory_space<vmem>>, vector<8x256xf32>,
    %c255_i32 = arith.constant 255 : i32
    %57 = tpu.dynamic_rotate %32 by %c255_i32 dim 1 : vector<8x256xf32>, i32 -> vector<8x256xf32>
    %c5 = arith.constant 5 : index
    %c0_44 = arith.constant 0 : index
    %c0_45 = arith.constant 0 : index
    %58 = vector.load %arg15[%c5, %c0_44, %c0_45] : memref<9x1x256xf32, #tpu.memory_space<vmem>>, vector<1x1x256xf32>
    %59 = vector.shape_cast %58 : vector<1x1x256xf32> to vector<1x256xf32>
    %60 = vector.broadcast %59 : vector<1x256xf32> to vector<8x256xf32>
    %61 = arith.mulf %57, %60 : vector<8x256xf32>
    %c40 = arith.constant 40 : index
    %c0_46 = arith.constant 0 : index
    %62 = vector.load %arg18[%c40, %c0_46] : memref<72x256xf32, #tpu.memory_space<vmem>>, vector<8x256xf32>
    tpu.vector_store %arg18[%c40, %c0_46], %61 {strides = array<i32>} : memref<72x256xf32, #tpu.memory_space<vmem>>, vector<8x256xf32>,
    %c241_i32 = arith.constant 241 : i32
    %63 = tpu.dynamic_rotate %32 by %c241_i32 dim 1 : vector<8x256xf32>, i32 -> vector<8x256xf32>
    %c6 = arith.constant 6 : index
    %c0_47 = arith.constant 0 : index
    %c0_48 = arith.constant 0 : index
    %64 = vector.load %arg15[%c6, %c0_47, %c0_48] : memref<9x1x256xf32, #tpu.memory_space<vmem>>, vector<1x1x256xf32>
    %65 = vector.shape_cast %64 : vector<1x1x256xf32> to vector<1x256xf32>
    %66 = vector.broadcast %65 : vector<1x256xf32> to vector<8x256xf32>
    %67 = arith.mulf %63, %66 : vector<8x256xf32>
    %c48 = arith.constant 48 : index
    %c0_49 = arith.constant 0 : index
    %68 = vector.load %arg18[%c48, %c0_49] : memref<72x256xf32, #tpu.memory_space<vmem>>, vector<8x256xf32>
    tpu.vector_store %arg18[%c48, %c0_49], %67 {strides = array<i32>} : memref<72x256xf32, #tpu.memory_space<vmem>>, vector<8x256xf32>,
    %c240_i32 = arith.constant 240 : i32
    %69 = tpu.dynamic_rotate %32 by %c240_i32 dim 1 : vector<8x256xf32>, i32 -> vector<8x256xf32>
    %c7 = arith.constant 7 : index
    %c0_50 = arith.constant 0 : index
    %c0_51 = arith.constant 0 : index
    %70 = vector.load %arg15[%c7, %c0_50, %c0_51] : memref<9x1x256xf32, #tpu.memory_space<vmem>>, vector<1x1x256xf32>
    %71 = vector.shape_cast %70 : vector<1x1x256xf32> to vector<1x256xf32>
    %72 = vector.broadcast %71 : vector<1x256xf32> to vector<8x256xf32>
    %73 = arith.mulf %69, %72 : vector<8x256xf32>
    %c56 = arith.constant 56 : index
    %c0_52 = arith.constant 0 : index
    %74 = vector.load %arg18[%c56, %c0_52] : memref<72x256xf32, #tpu.memory_space<vmem>>, vector<8x256xf32>
    tpu.vector_store %arg18[%c56, %c0_52], %73 {strides = array<i32>} : memref<72x256xf32, #tpu.memory_space<vmem>>, vector<8x256xf32>,
    %c239_i32 = arith.constant 239 : i32
    %75 = tpu.dynamic_rotate %32 by %c239_i32 dim 1 : vector<8x256xf32>, i32 -> vector<8x256xf32>
    %c8_53 = arith.constant 8 : index
    %c0_54 = arith.constant 0 : index
    %c0_55 = arith.constant 0 : index
    %76 = vector.load %arg15[%c8_53, %c0_54, %c0_55] : memref<9x1x256xf32, #tpu.memory_space<vmem>>, vector<1x1x256xf32>
    %77 = vector.shape_cast %76 : vector<1x1x256xf32> to vector<1x256xf32>
    %78 = vector.broadcast %77 : vector<1x256xf32> to vector<8x256xf32>
    %79 = arith.mulf %75, %78 : vector<8x256xf32>
    %c64 = arith.constant 64 : index
    %c0_56 = arith.constant 0 : index
    %80 = vector.load %arg18[%c64, %c0_56] : memref<72x256xf32, #tpu.memory_space<vmem>>, vector<8x256xf32>
    tpu.vector_store %arg18[%c64, %c0_56], %79 {strides = array<i32>} : memref<72x256xf32, #tpu.memory_space<vmem>>, vector<8x256xf32>,
    %c0_57 = arith.constant 0 : index
    %c0_58 = arith.constant 0 : index
    %81 = vector.load %arg8[%c0_57, %c0_58] : memref<8x72xf32, #tpu.memory_space<vmem>>, vector<8x72xf32>
    %c0_59 = arith.constant 0 : index
    %c0_60 = arith.constant 0 : index
    %82 = vector.load %arg18[%c0_59, %c0_60] : memref<72x256xf32, #tpu.memory_space<vmem>>, vector<72x256xf32>
    %cst_61 = arith.constant dense<0.000000e+00> : vector<8x256xf32>
    %83 = tpu.matmul %81, %82, %cst_61 {dimension_numbers = #tpu.dot_dimension_numbers<[1], [0], [0], [1], [0, 0, 1, 1], [], []>} : vector<8x72xf32>, vector<72x256xf32>, vector<8x256xf32> -> vector<8x256xf32>
    %c0_62 = arith.constant 0 : index
    %c0_63 = arith.constant 0 : index
    %84 = vector.load %arg9[%c0_62, %c0_63] : memref<8x1xf32, #tpu.memory_space<vmem>>, vector<8x1xf32>
    %85 = vector.broadcast %84 : vector<8x1xf32> to vector<8x256xf32>
    %86 = arith.mulf %83, %85 : vector<8x256xf32>
    %c0_64 = arith.constant 0 : index
    %c0_65 = arith.constant 0 : index
    %87 = vector.load %arg10[%c0_64, %c0_65] : memref<8x1xf32, #tpu.memory_space<vmem>>, vector<8x1xf32>
    %88 = vector.broadcast %87 : vector<8x1xf32> to vector<8x256xf32>
    %89 = arith.addf %86, %88 : vector<8x256xf32>
    %cst_66 = arith.constant 0.00999999977 : f32
    %90 = vector.broadcast %cst_66 : f32 to vector<8x256xf32>
    %91 = arith.mulf %90, %89 : vector<8x256xf32>
    %92 = arith.maximumf %89, %91 : vector<8x256xf32>
    %c32_67 = arith.constant 32 : index
    %c0_68 = arith.constant 0 : index
    %93 = vector.load %arg19[%c32_67, %c0_68] : memref<72x256xf32, #tpu.memory_space<vmem>>, vector<8x256xf32>
    tpu.vector_store %arg19[%c32_67, %c0_68], %92 {strides = array<i32>} : memref<72x256xf32, #tpu.memory_space<vmem>>, vector<8x256xf32>,
    %c17_i32_69 = arith.constant 17 : i32
    %94 = tpu.dynamic_rotate %92 by %c17_i32_69 dim 1 : vector<8x256xf32>, i32 -> vector<8x256xf32>
    %c0_70 = arith.constant 0 : index
    %c0_71 = arith.constant 0 : index
    %c0_72 = arith.constant 0 : index
    %95 = vector.load %arg15[%c0_70, %c0_71, %c0_72] : memref<9x1x256xf32, #tpu.memory_space<vmem>>, vector<1x1x256xf32>
    %96 = vector.shape_cast %95 : vector<1x1x256xf32> to vector<1x256xf32>
    %97 = vector.broadcast %96 : vector<1x256xf32> to vector<8x256xf32>
    %98 = arith.mulf %94, %97 : vector<8x256xf32>
    %c0_73 = arith.constant 0 : index
    %c0_74 = arith.constant 0 : index
    %99 = vector.load %arg19[%c0_73, %c0_74] : memref<72x256xf32, #tpu.memory_space<vmem>>, vector<8x256xf32>
    tpu.vector_store %arg19[%c0_73, %c0_74], %98 {strides = array<i32>} : memref<72x256xf32, #tpu.memory_space<vmem>>, vector<8x256xf32>,
    %c16_i32_75 = arith.constant 16 : i32
    %100 = tpu.dynamic_rotate %92 by %c16_i32_75 dim 1 : vector<8x256xf32>, i32 -> vector<8x256xf32>
    %c1_76 = arith.constant 1 : index
    %c0_77 = arith.constant 0 : index
    %c0_78 = arith.constant 0 : index
    %101 = vector.load %arg15[%c1_76, %c0_77, %c0_78] : memref<9x1x256xf32, #tpu.memory_space<vmem>>, vector<1x1x256xf32>
    %102 = vector.shape_cast %101 : vector<1x1x256xf32> to vector<1x256xf32>
    %103 = vector.broadcast %102 : vector<1x256xf32> to vector<8x256xf32>
    %104 = arith.mulf %100, %103 : vector<8x256xf32>
    %c8_79 = arith.constant 8 : index
    %c0_80 = arith.constant 0 : index
    %105 = vector.load %arg19[%c8_79, %c0_80] : memref<72x256xf32, #tpu.memory_space<vmem>>, vector<8x256xf32>
    tpu.vector_store %arg19[%c8_79, %c0_80], %104 {strides = array<i32>} : memref<72x256xf32, #tpu.memory_space<vmem>>, vector<8x256xf32>,
    %c15_i32_81 = arith.constant 15 : i32
    %106 = tpu.dynamic_rotate %92 by %c15_i32_81 dim 1 : vector<8x256xf32>, i32 -> vector<8x256xf32>
    %c2_82 = arith.constant 2 : index
    %c0_83 = arith.constant 0 : index
    %c0_84 = arith.constant 0 : index
    %107 = vector.load %arg15[%c2_82, %c0_83, %c0_84] : memref<9x1x256xf32, #tpu.memory_space<vmem>>, vector<1x1x256xf32>
    %108 = vector.shape_cast %107 : vector<1x1x256xf32> to vector<1x256xf32>
    %109 = vector.broadcast %108 : vector<1x256xf32> to vector<8x256xf32>
    %110 = arith.mulf %106, %109 : vector<8x256xf32>
    %c16_85 = arith.constant 16 : index
    %c0_86 = arith.constant 0 : index
    %111 = vector.load %arg19[%c16_85, %c0_86] : memref<72x256xf32, #tpu.memory_space<vmem>>, vector<8x256xf32>
    tpu.vector_store %arg19[%c16_85, %c0_86], %110 {strides = array<i32>} : memref<72x256xf32, #tpu.memory_space<vmem>>, vector<8x256xf32>,
    %c1_i32_87 = arith.constant 1 : i32
    %112 = tpu.dynamic_rotate %92 by %c1_i32_87 dim 1 : vector<8x256xf32>, i32 -> vector<8x256xf32>
    %c3_88 = arith.constant 3 : index
    %c0_89 = arith.constant 0 : index
    %c0_90 = arith.constant 0 : index
    %113 = vector.load %arg15[%c3_88, %c0_89, %c0_90] : memref<9x1x256xf32, #tpu.memory_space<vmem>>, vector<1x1x256xf32>
    %114 = vector.shape_cast %113 : vector<1x1x256xf32> to vector<1x256xf32>
    %115 = vector.broadcast %114 : vector<1x256xf32> to vector<8x256xf32>
    %116 = arith.mulf %112, %115 : vector<8x256xf32>
    %c24_91 = arith.constant 24 : index
    %c0_92 = arith.constant 0 : index
    %117 = vector.load %arg19[%c24_91, %c0_92] : memref<72x256xf32, #tpu.memory_space<vmem>>, vector<8x256xf32>
    tpu.vector_store %arg19[%c24_91, %c0_92], %116 {strides = array<i32>} : memref<72x256xf32, #tpu.memory_space<vmem>>, vector<8x256xf32>,
    %c255_i32_93 = arith.constant 255 : i32
    %118 = tpu.dynamic_rotate %92 by %c255_i32_93 dim 1 : vector<8x256xf32>, i32 -> vector<8x256xf32>
    %c5_94 = arith.constant 5 : index
    %c0_95 = arith.constant 0 : index
    %c0_96 = arith.constant 0 : index
    %119 = vector.load %arg15[%c5_94, %c0_95, %c0_96] : memref<9x1x256xf32, #tpu.memory_space<vmem>>, vector<1x1x256xf32>
    %120 = vector.shape_cast %119 : vector<1x1x256xf32> to vector<1x256xf32>
    %121 = vector.broadcast %120 : vector<1x256xf32> to vector<8x256xf32>
    %122 = arith.mulf %118, %121 : vector<8x256xf32>
    %c40_97 = arith.constant 40 : index
    %c0_98 = arith.constant 0 : index
    %123 = vector.load %arg19[%c40_97, %c0_98] : memref<72x256xf32, #tpu.memory_space<vmem>>, vector<8x256xf32>
    tpu.vector_store %arg19[%c40_97, %c0_98], %122 {strides = array<i32>} : memref<72x256xf32, #tpu.memory_space<vmem>>, vector<8x256xf32>,
    %c241_i32_99 = arith.constant 241 : i32
    %124 = tpu.dynamic_rotate %92 by %c241_i32_99 dim 1 : vector<8x256xf32>, i32 -> vector<8x256xf32>
    %c6_100 = arith.constant 6 : index
    %c0_101 = arith.constant 0 : index
    %c0_102 = arith.constant 0 : index
    %125 = vector.load %arg15[%c6_100, %c0_101, %c0_102] : memref<9x1x256xf32, #tpu.memory_space<vmem>>, vector<1x1x256xf32>
    %126 = vector.shape_cast %125 : vector<1x1x256xf32> to vector<1x256xf32>
    %127 = vector.broadcast %126 : vector<1x256xf32> to vector<8x256xf32>
    %128 = arith.mulf %124, %127 : vector<8x256xf32>
    %c48_103 = arith.constant 48 : index
    %c0_104 = arith.constant 0 : index
    %129 = vector.load %arg19[%c48_103, %c0_104] : memref<72x256xf32, #tpu.memory_space<vmem>>, vector<8x256xf32>
    tpu.vector_store %arg19[%c48_103, %c0_104], %128 {strides = array<i32>} : memref<72x256xf32, #tpu.memory_space<vmem>>, vector<8x256xf32>,
    %c240_i32_105 = arith.constant 240 : i32
    %130 = tpu.dynamic_rotate %92 by %c240_i32_105 dim 1 : vector<8x256xf32>, i32 -> vector<8x256xf32>
    %c7_106 = arith.constant 7 : index
    %c0_107 = arith.constant 0 : index
    %c0_108 = arith.constant 0 : index
    %131 = vector.load %arg15[%c7_106, %c0_107, %c0_108] : memref<9x1x256xf32, #tpu.memory_space<vmem>>, vector<1x1x256xf32>
    %132 = vector.shape_cast %131 : vector<1x1x256xf32> to vector<1x256xf32>
    %133 = vector.broadcast %132 : vector<1x256xf32> to vector<8x256xf32>
    %134 = arith.mulf %130, %133 : vector<8x256xf32>
    %c56_109 = arith.constant 56 : index
    %c0_110 = arith.constant 0 : index
    %135 = vector.load %arg19[%c56_109, %c0_110] : memref<72x256xf32, #tpu.memory_space<vmem>>, vector<8x256xf32>
    tpu.vector_store %arg19[%c56_109, %c0_110], %134 {strides = array<i32>} : memref<72x256xf32, #tpu.memory_space<vmem>>, vector<8x256xf32>,
    %c239_i32_111 = arith.constant 239 : i32
    %136 = tpu.dynamic_rotate %92 by %c239_i32_111 dim 1 : vector<8x256xf32>, i32 -> vector<8x256xf32>
    %c8_112 = arith.constant 8 : index
    %c0_113 = arith.constant 0 : index
    %c0_114 = arith.constant 0 : index
    %137 = vector.load %arg15[%c8_112, %c0_113, %c0_114] : memref<9x1x256xf32, #tpu.memory_space<vmem>>, vector<1x1x256xf32>
    %138 = vector.shape_cast %137 : vector<1x1x256xf32> to vector<1x256xf32>
    %139 = vector.broadcast %138 : vector<1x256xf32> to vector<8x256xf32>
    %140 = arith.mulf %136, %139 : vector<8x256xf32>
    %c64_115 = arith.constant 64 : index
    %c0_116 = arith.constant 0 : index
    %141 = vector.load %arg19[%c64_115, %c0_116] : memref<72x256xf32, #tpu.memory_space<vmem>>, vector<8x256xf32>
    tpu.vector_store %arg19[%c64_115, %c0_116], %140 {strides = array<i32>} : memref<72x256xf32, #tpu.memory_space<vmem>>, vector<8x256xf32>,
    %c0_117 = arith.constant 0 : index
    %c0_118 = arith.constant 0 : index
    %142 = vector.load %arg11[%c0_117, %c0_118] : memref<8x72xf32, #tpu.memory_space<vmem>>, vector<8x72xf32>
    %c0_119 = arith.constant 0 : index
    %c0_120 = arith.constant 0 : index
    %143 = vector.load %arg19[%c0_119, %c0_120] : memref<72x256xf32, #tpu.memory_space<vmem>>, vector<72x256xf32>
    %cst_121 = arith.constant dense<0.000000e+00> : vector<8x256xf32>
    %144 = tpu.matmul %142, %143, %cst_121 {dimension_numbers = #tpu.dot_dimension_numbers<[1], [0], [0], [1], [0, 0, 1, 1], [], []>} : vector<8x72xf32>, vector<72x256xf32>, vector<8x256xf32> -> vector<8x256xf32>
    %c0_122 = arith.constant 0 : index
    %c0_123 = arith.constant 0 : index
    %145 = vector.load %arg12[%c0_122, %c0_123] : memref<8x4xf32, #tpu.memory_space<vmem>>, vector<8x4xf32>
    %cst_124 = arith.constant dense<0.000000e+00> : vector<8x256xf32>
    %146 = tpu.matmul %145, %11, %cst_124 {dimension_numbers = #tpu.dot_dimension_numbers<[1], [0], [0], [1], [0, 0, 1, 1], [], []>} : vector<8x4xf32>, vector<4x256xf32>, vector<8x256xf32> -> vector<8x256xf32>
    %c0_125 = arith.constant 0 : index
    %c0_126 = arith.constant 0 : index
    %147 = vector.load %arg13[%c0_125, %c0_126] : memref<8x4xf32, #tpu.memory_space<vmem>>, vector<8x4xf32>
    %cst_127 = arith.constant dense<0.000000e+00> : vector<8x256xf32>
    %148 = tpu.matmul %147, %1, %cst_127 {dimension_numbers = #tpu.dot_dimension_numbers<[1], [0], [0], [1], [0, 0, 1, 1], [], []>} : vector<8x4xf32>, vector<4x256xf32>, vector<8x256xf32> -> vector<8x256xf32>
    %149 = arith.addf %146, %148 : vector<8x256xf32>
    %c0_128 = arith.constant 0 : index
    %c0_129 = arith.constant 0 : index
    %150 = vector.load %arg14[%c0_128, %c0_129] : memref<8x1xf32, #tpu.memory_space<vmem>>, vector<8x1xf32>
    %151 = vector.broadcast %150 : vector<8x1xf32> to vector<8x256xf32>
    %152 = arith.addf %149, %151 : vector<8x256xf32>
    %153 = arith.addf %152, %144 : vector<8x256xf32>
    %c0_130 = arith.constant 0 : index
    %c0_131 = arith.constant 0 : index
    %154 = vector.load %arg16[%c0_130, %c0_131] : memref<8x256xf32, #tpu.memory_space<vmem>>, vector<8x256xf32>
    tpu.vector_store %arg16[%c0_130, %c0_131], %153 {strides = array<i32>} : memref<8x256xf32, #tpu.memory_space<vmem>>, vector<8x256xf32>,
    return
  }
  func.func @transform_0(%arg0: i32) -> (i32, i32) {
    %c0_i32 = arith.constant 0 : i32
    %c0_i32_0 = arith.constant 0 : i32
    return %c0_i32, %arg0 : i32, i32
  }
  func.func @transform_1(%arg0: i32) -> (i32, i32) {
    %c0_i32 = arith.constant 0 : i32
    %c0_i32_0 = arith.constant 0 : i32
    return %c0_i32, %arg0 : i32, i32
  }
  func.func @transform_2(%arg0: i32) -> (i32, i32) {
    %c0_i32 = arith.constant 0 : i32
    %c0_i32_0 = arith.constant 0 : i32
    %c0_i32_1 = arith.constant 0 : i32
    return %c0_i32, %c0_i32_0 : i32, i32
  }
  func.func @transform_3(%arg0: i32) -> (i32, i32) {
    %c0_i32 = arith.constant 0 : i32
    %c0_i32_0 = arith.constant 0 : i32
    %c0_i32_1 = arith.constant 0 : i32
    return %c0_i32, %c0_i32_0 : i32, i32
  }
  func.func @transform_4(%arg0: i32) -> (i32, i32) {
    %c0_i32 = arith.constant 0 : i32
    %c0_i32_0 = arith.constant 0 : i32
    %c0_i32_1 = arith.constant 0 : i32
    return %c0_i32, %c0_i32_0 : i32, i32
  }
  func.func @transform_5(%arg0: i32) -> (i32, i32) {
    %c0_i32 = arith.constant 0 : i32
    %c0_i32_0 = arith.constant 0 : i32
    %c0_i32_1 = arith.constant 0 : i32
    return %c0_i32, %c0_i32_0 : i32, i32
  }
  func.func @transform_6(%arg0: i32) -> (i32, i32) {
    %c0_i32 = arith.constant 0 : i32
    %c0_i32_0 = arith.constant 0 : i32
    %c0_i32_1 = arith.constant 0 : i32
    return %c0_i32, %c0_i32_0 : i32, i32
  }
  func.func @transform_7(%arg0: i32) -> (i32, i32) {
    %c0_i32 = arith.constant 0 : i32
    %c0_i32_0 = arith.constant 0 : i32
    %c0_i32_1 = arith.constant 0 : i32
    return %c0_i32, %c0_i32_0 : i32, i32
  }
  func.func @transform_8(%arg0: i32) -> (i32, i32) {
    %c0_i32 = arith.constant 0 : i32
    %c0_i32_0 = arith.constant 0 : i32
    %c0_i32_1 = arith.constant 0 : i32
    return %c0_i32, %c0_i32_0 : i32, i32
  }
  func.func @transform_9(%arg0: i32) -> (i32, i32) {
    %c0_i32 = arith.constant 0 : i32
    %c0_i32_0 = arith.constant 0 : i32
    %c0_i32_1 = arith.constant 0 : i32
    return %c0_i32, %c0_i32_0 : i32, i32
  }
  func.func @transform_10(%arg0: i32) -> (i32, i32) {
    %c0_i32 = arith.constant 0 : i32
    %c0_i32_0 = arith.constant 0 : i32
    %c0_i32_1 = arith.constant 0 : i32
    return %c0_i32, %c0_i32_0 : i32, i32
  }
  func.func @transform_11(%arg0: i32) -> (i32, i32) {
    %c0_i32 = arith.constant 0 : i32
    %c0_i32_0 = arith.constant 0 : i32
    %c0_i32_1 = arith.constant 0 : i32
    return %c0_i32, %c0_i32_0 : i32, i32
  }
  func.func @transform_12(%arg0: i32) -> (i32, i32) {
    %c0_i32 = arith.constant 0 : i32
    %c0_i32_0 = arith.constant 0 : i32
    %c0_i32_1 = arith.constant 0 : i32
    return %c0_i32, %c0_i32_0 : i32, i32
  }
  func.func @transform_13(%arg0: i32) -> (i32, i32) {
    %c0_i32 = arith.constant 0 : i32
    %c0_i32_0 = arith.constant 0 : i32
    %c0_i32_1 = arith.constant 0 : i32
    return %c0_i32, %c0_i32_0 : i32, i32
  }
  func.func @transform_14(%arg0: i32) -> (i32, i32, i32) {
    %c0_i32 = arith.constant 0 : i32
    %c0_i32_0 = arith.constant 0 : i32
    %c0_i32_1 = arith.constant 0 : i32
    %c0_i32_2 = arith.constant 0 : i32
    return %c0_i32, %c0_i32_0, %c0_i32_1 : i32, i32, i32
  }
  func.func @transform_15(%arg0: i32) -> (i32, i32) {
    %c0_i32 = arith.constant 0 : i32
    %c0_i32_0 = arith.constant 0 : i32
    return %c0_i32, %arg0 : i32, i32
  }
}

</mosaic_0001>

<bundles_post_ra>
// kernel: decoder_block_forward.1
= control target key start
LH: loop header
LB: loop body
LE: loop exit
PB: predicated region body
PF: predicated region fallthrough
CT: control target
= control target key end

     0   :  { %s1451_s18 = smov 0   ;;  %s1751_s0 = inlined_call_operand.vmem [shape: f32[4,512], index: 0, kind: input, shape index: {}]   ;;  %s1752_s1 = inlined_call_operand.vmem [shape: f32[4,512], index: 1, kind: input, shape index: {}]   ;;  %s1753_s2 = inlined_call_operand.vmem [shape: f32[4,16], index: 2, kind: input, shape index: {}]   ;;  %s1754_s3 = inlined_call_operand.vmem [shape: f32[4,1], index: 3, kind: input, shape index: {}]   ;;  %s1755_s4 = inlined_call_operand.vmem [shape: f32[4,1], index: 4, kind: input, shape index: {}]   ;;  %s1756_s5 = inlined_call_operand.vmem [shape: f32[4,1], index: 5, kind: input, shape index: {}]   ;;  %s1757_s6 = inlined_call_operand.vmem [shape: f32[4,1], index: 6, kind: input, shape index: {}]   ;;  %s1758_s7 = inlined_call_operand.vmem [shape: f32[8,72], index: 7, kind: input, shape index: {}]   ;;  %s1759_s8 = inlined_call_operand.vmem [shape: f32[8,1], index: 8, kind: input, shape index: {}]   ;;  %s1760_s9 = inlined_call_operand.vmem [shape: f32[8,1], index: 9, kind: input, shape index: {}]   ;;  %s1761_s10 = inlined_call_operand.vmem [shape: f32[8,72], index: 10, kind: input, shape index: {}]   ;;  %s1762_s11 = inlined_call_operand.vmem [shape: f32[8,4], index: 11, kind: input, shape index: {}]   ;;  %s1763_s12 = inlined_call_operand.vmem [shape: f32[8,4], index: 12, kind: input, shape index: {}]   ;;  %s1764_s13 = inlined_call_operand.vmem [shape: f32[8,1], index: 13, kind: input, shape index: {}]   ;;  %s1765_s14 = inlined_call_operand.vmem [shape: f32[9,1,256], index: 14, kind: input, shape index: {}]   ;;  %s1766_s15 = inlined_call_operand.vmem [shape: f32[8,512], index: 15, kind: output, shape index: {}]  }
   0x1 LB: > { %s1291_s19 = sadd.s32 4294967295, %s1359_s18   ;;  %p1295_p0 = scmp.ge.s32.totalorder %s1359_s18, 1  ;;  %s1359_s18 = sphi %s1451_s18, %s25_s18  }
   0x2   : > { %p449_p1 = scmp.lt.s32.totalorder %s1359_s18, 3 }
   0x4   : > { %p450_p2 = pnand %p1295_p0, %p449_p1 }
   0x5   : > { %s1296_s20 = sshll.u32 (!%p450_p2), %s1291_s19, 1  ;;  %s1361_s25 = smov (!%p450_p2), 1  }
   0x6   : > { %453 = sbr.rel (%p450_p2) target bundleno = 916 (0x394), region = 80  ;;  %p503_p3 = scmp.lt.s32.totalorder (!%p450_p2), %s1296_s20, 3 }
   0x7   : > { %s1769_s26 = smov (!%p450_p2), 16   ;;  %s1363_s27 = smov (!%p450_p2), 17  }
   0x8   : > { %s1367_s17 = smov (!%p450_p2), 111   ;;  %s1368_s19 = smov (!%p450_p2), 113  }
   0x9   : > { %s1771_s22 = smov (!%p450_p2), 127   ;;  %s1767_s23 = smov (!%p450_p2), 15  }
   0xa   : > { %s1773_s30 = smov (!%p450_p2), 127  }
   0xb   : > { %s1777_s20 = smov (!%p503_p3, %s1296_s20), 3  ;;  %v539_v9 = vlaneseq  ;;  %v655_v15 = vld [vmem:[%s1756_s5] sm:$0xf]  ;;  %v1364_v17 = vmov 0   ;;  %vm591_vm3 = vcmask 130048   ;;  %vm851_vm9 = vcmask 588800  }
   0xc   : > { %s1297_s21 = sshll.u32 %s1777_s20, 2  ;;  %v666_v16 = vld [vmem:[%s1757_s6] sm:$0xf]  ;;  %1350 = vset.pattern.permute.xlu0 %v1364_v17  ;;  %1351 = vset.pattern.permute.xlu1 %v1364_v17  ;;  %v1365_v37 = vmov 839922192   ;;  %vm1117_vm10 = vcmask 1043456  }
   0xd   : > { %s506_s24 = scalar_lea.vmem %s1751_s0, %s1297_s21  ;;  %v1473_v11 = vand.u32 127, %v539_v9  ;;  %1352 = vset.pattern.permute.xlu2 %v1364_v17  ;;  %v643_v20 = vld [vmem:[%s1755_s4] sm:$0xf]  ;;  %v661_v38 = vunpack.c.l.s4 %v1365_v37  ;;  %s512_s16 = scalar_lea.vmem %s1752_s1, %s1297_s21  ;;  %vm1113_vm11 = vcmask 31744  }
   0xe   : > { %v520_v0 = vld [vmem:[%s506_s24] sm:$0xff]  ;;  %s1366_s21 = smov 112  }
   0xf   : > { %523 = vst [vmem:[#allocation1] ss:$2 sm:$0xff] %v520_v0  ;;  %vm561_vm0 = vcmp.lt.s32.totalorder %v1473_v11, 16  ;;  %vm541_vm1 = vcmp.lt.s32.totalorder %v1473_v11, 1  ;;  %v635_v21 = vld [vmem:[%s1754_s3] sm:$0xf]  ;;  %v662_v39 = vunpack.c.0.s8 %v661_v38 }
  0x10   : > { %vm575_vm2 = vcmp.lt.s32.totalorder %v1473_v11, 17  ;;  %v586_v34 = vld [vmem:[%s1753_s2] sm:$0xf]  ;;  %vm800_vm4 = vcmp.lt.s32.totalorder %v1473_v11, 112  ;;  %vm818_vm5 = vcmp.lt.s32.totalorder %v1473_v11, 111  ;;  %vm782_vm6 = vcmp.lt.s32.totalorder %v1473_v11, 113 }
  0x11   : > { %v521_v40 = vld [vmem:[%s512_s16] sm:$0xff]  ;;  %vm764_vm7 = vcmp.lt.s32.totalorder %v1473_v11, 127  ;;  %vm729_vm8 = vcmp.lt.s32.totalorder %v1473_v11, 15  ;;  %s1774_s16 = smov 15  }
  0x12   : > { %v1107_v11 = vld [vmem:[%s1762_s11] sm:$0xff] }
  0x16   : > { %v524_v1 = vld.sshfl [vmem:[#allocation1] sm:$0xff pattern:$0x75316420]  ;;  %v525_v2 = vld.sshfl [vmem:[#allocation1 + $0x8] sm:$0xff pattern:$0x75316420] }
  0x17   : > { %530 = vst [vmem:[#allocation1] ss:$2 sm:$0xff] %v520_v0 }
  0x18   : > { %528 = vst [vmem:[#allocation2 + $0x10] sm:$0xf] %v524_v1  ;;  %v903_v1 = vld [vmem:[%s1760_s9] sm:$0xff] }
  0x19   : > { %529 = vst [vmem:[#allocation2] sm:$0xf] %v525_v2  ;;  %v895_v2 = vld [vmem:[%s1759_s8] sm:$0xff] }
  0x1e   : > { %v531_v3 = vld.sshfl [vmem:[#allocation1] sm:$0xff pattern:$0x75316420]  ;;  %v532_v4 = vld.sshfl [vmem:[#allocation1 + $0x8] sm:$0xff pattern:$0x75316420] }
  0x1f   : > { %535 = vrot.lane.b32.xlu1 %v531_v3, %s1361_s25  ;;  %552 = vst [vmem:[#allocation1] ss:$2 sm:$0xff] %v520_v0 }
  0x26   : > { %v553_v5 = vld.sshfl [vmem:[#allocation1] sm:$0xff pattern:$0x75316420]  ;;  %v554_v6 = vld.sshfl [vmem:[#allocation1 + $0x8] sm:$0xff pattern:$0x75316420] }
  0x27   : > { %566 = vst [vmem:[#allocation1] ss:$2 sm:$0xff] %v520_v0  ;;  %537 = vrot.lane.b32.xlu1 %v532_v4, %s1361_s25  ;;  %557 = vrot.lane.b32.xlu2 %v553_v5, %s1769_s26  ;;  %v1309_v5 = vld [vmem:[%s1765_s14 + $0xe] sm:$0x3] }
  0x2e   : > { %v567_v7 = vld.sshfl [vmem:[#allocation1] sm:$0xff pattern:$0x75316420]  ;;  %v568_v8 = vld.sshfl [vmem:[#allocation1 + $0x8] sm:$0xff pattern:$0x75316420] }
  0x2f   : > { %571 = vrot.lane.b32.xlu0 %v567_v7, %s1363_s27  ;;  %559 = vrot.lane.b32.xlu2 %v554_v6, %s1769_s26  ;;  %v1310_v6 = vld [vmem:[%s1765_s14 + $0x10] sm:$0x3]  ;;  %v806_v7 = vperm.slane %v1309_v5, 0 }
  0x30   : > { %669 = vperm.xlu1 %1351, %v666_v16   ;;  %v825_v9 = vperm.slane %v1310_v6, 1 }
  0x37   : > { %573 = vrot.lane.b32.xlu0 %v568_v8, %s1363_s27  ;;  %638 = vperm.xlu2 %1352, %v635_v21   ;;  %v824_v8 = vperm.slane %v1310_v6, 0 }
  0x38   : > { %646 = vperm.xlu1 %1351, %v643_v20  }
  0x3f   : > { %658 = vperm.xlu0 %1350, %v655_v15  }
  0x81   : > { %v558_v10 = vpop.permute.xlu2 %557 }
  0x89   : > { %v560_v12 = vpop.permute.xlu2 %559 }
  0x8a   : > { %v562_v13 = vsel %vm561_vm0, %v558_v10, %v560_v12  ;;  %v563_v14 = vsel %vm561_vm0, %v560_v12, %v558_v10  ;;  %v807_v10 = vperm.slane %v1309_v5, 1 }
  0x8b   : > { %564 = vst [vmem:[#allocation2 + $0x18] sm:$0xf] %v563_v14 }
  0x8c   : > { %565 = vst [vmem:[#allocation2 + $0x8] sm:$0xf] %v562_v13 }
  0x91   : > { %v536_v18 = vpop.permute.xlu1 %535  ;;  %v639_v51 = vpop.permute.xlu2 %638 }
  0x99   : > { %v538_v19 = vpop.permute.xlu1 %537 }
  0x9a   : > { %v542_v22 = vsel %vm541_vm1, %v536_v18, %v538_v19  ;;  %v543_v23 = vsel %vm541_vm1, %v538_v19, %v536_v18 }
  0x9b   : > { %v546_v24 = vrot.slane %v543_v23, 4  ;;  %v547_v25 = vrot.slane %v542_v22, 4  ;;  %v1308_v23 = vld [vmem:[%s1765_s14 + $0xc] sm:$0x3] }
  0x9d   : > { %550 = vst [vmem:[#allocation2 + $0x10] sm:$0xf0] %v546_v24  ;;  %v788_v24 = vperm.slane %v1308_v23, 0 }
  0x9e   : > { %551 = vst [vmem:[#allocation2] sm:$0xf0] %v547_v25  ;;  %v789_v25 = vperm.slane %v1308_v23, 1 }
  0xa1   : > { %v572_v26 = vpop.permute.xlu0 %571 }
  0xa2   : > { %v670_v42 = vpop.permute.xlu1 %669 }
  0xa3   : > { %v674_v44 = vperm.slane %v670_v42, %v662_v39 }
  0xa4   : > { %v587_v35 = vld [vmem:[#allocation2 + $0x10] sm:$0xff] }
  0xa5   : > { %v588_v36 = vld [vmem:[#allocation2] sm:$0xff] }
  0xa9   : > { %v574_v27 = vpop.permute.xlu0 %573 }
  0xaa   : > { %v576_v28 = vsel %vm575_vm2, %v572_v26, %v574_v27  ;;  %v577_v29 = vsel %vm575_vm2, %v574_v27, %v572_v26  ;;  %v647_v55 = vpop.permute.xlu1 %646 }
  0xab   : > { %v580_v30 = vrot.slane %v577_v29, 4  ;;  %v581_v31 = vrot.slane %v576_v28, 4 }
  0xad   : > { %584 = vst [vmem:[#allocation2 + $0x18] sm:$0xf0] %v580_v30 }
  0xae   : > { %585 = vst [vmem:[#allocation2 + $0x8] sm:$0xf0] %v581_v31 }
  0xb1   : > { %v659_v41 = vpop.permute.xlu0 %658 }
  0xb2   : > { %v663_v43 = vperm.slane %v659_v41, %v662_v39 }
  0xb4   : > { %v589_v32 = vld [vmem:[#allocation2 + $0x18] sm:$0xff]  ;;  %v665_v45 = vmul.f32 %v663_v43, %v521_v40 }
  0xb5   : > { %609 = vmatpush.msra.mxu0 %v589_v32  ;;  %v590_v33 = vld [vmem:[#allocation2 + $0x8] sm:$0xff]  ;;  %v1306_v32 = vld [vmem:[%s1765_s14 + $0x6] sm:$0x3] }
  0xb6   : > { %629 = vmatpush.msra.mxu1 %v590_v33  ;;  %v676_v46 = vadd.f32 %v674_v44, %v665_v45  ;;  %v753_v38 = vperm.slane %v1306_v32, 1 }
  0xb7   : > { %610 = vmatpush.msra.mxu0 %v587_v35  ;;  %v752_v35 = vperm.slane %v1306_v32, 0 }
  0xb8   : > { %630 = vmatpush.msra.mxu1 %v588_v36  ;;  %1302 = vmatmul.msk.f32.vlgmr.msra.gmra.mxu0 %vm591_vm3, %v586_v34  ;;  %v677_v47 = vmul.f32 0.01, %v676_v46 }
  0xb9   : > { %1303 = vmatmul.msk.f32.vlgmr.msra.gmra.mxu1 %vm591_vm3, %v586_v34  ;;  %v1307_v34 = vld [vmem:[%s1765_s14 + $0xa] sm:$0x3] }
  0xba   : > { %v678_v48 = vmax.f32 %v676_v46, %v677_v47  ;;  %v770_v36 = vperm.slane %v1307_v34, 0  ;;  %v771_v37 = vperm.slane %v1307_v34, 1  ;;  %v1318_v34 = vld [vmem:[%s1765_s14 + $0xe] sm:$0x3] }
  0xbc   : > { %683 = vst [vmem:[#allocation1 + $0x1] ss:$2 sm:$0xff] %v678_v48 }
  0xc3   : > { %v685_v49 = vld.sshfl [vmem:[#allocation1 + $0x8] sm:$0xff pattern:$0x75316420]  ;;  %v684_v50 = vld.sshfl [vmem:[#allocation1] sm:$0xff pattern:$0x75316420] }
  0xc4   : > { %689 = vst [vmem:[#allocation3 + $0x28] sm:$0xf0] %v685_v49  ;;  %v1305_v49 = vld [vmem:[%s1765_s14 + $0x4] sm:$0x3] }
  0xc5   : > { %688 = vst [vmem:[#allocation3 + $0x40] sm:$0xf0] %v684_v50 }
  0xc6   : > { %1110 = vst [vmem:[#allocation1] ss:$2 sm:$0xff] %v521_v40 }
 0x135   : > { %v1510_v52 = vpop.f32.mrf.mxu0 }
 0x136   : > { %v641_v53 = vmul.f32 %v639_v51, %v1510_v52  ;;  %v1513_v54 = vpop.f32.mrf.mxu1 }
 0x137   : > { %v642_v56 = vmul.f32 %v639_v51, %v1513_v54  ;;  %v735_v51 = vperm.slane %v1305_v49, 0 }
 0x138   : > { %v649_v57 = vadd.f32 %v647_v55, %v641_v53  ;;  %v736_v53 = vperm.slane %v1305_v49, 1 }
 0x139   : > { %v650_v58 = vadd.f32 %v647_v55, %v642_v56 }
 0x13a   : > { %v651_v59 = vmul.f32 0.01, %v649_v57 }
 0x13b   : > { %v652_v60 = vmul.f32 0.01, %v650_v58 }
 0x13c   : > { %v653_v61 = vmax.f32 %v649_v57, %v651_v59 }
 0x13d   : > { %v654_v62 = vmax.f32 %v650_v58, %v652_v60 }
 0x13e   : > { %679 = vst [vmem:[#allocation3 + $0x40] sm:$0xf] %v653_v61  ;;  %v698_v61 = vld [vmem:[%s1765_s14] sm:$0x3] }
 0x13f   : > { %680 = vst [vmem:[#allocation3 + $0x28] sm:$0xf] %v654_v62  ;;  %v1304_v62 = vld [vmem:[%s1765_s14 + $0x2] sm:$0x3] }
 0x145   : > { %v1516_v63 = vld [vmem:[#allocation3 + $0x40] sm:$0xff] }
 0x146   : > { %v1518_v0 = vld [vmem:[#allocation3 + $0x28] sm:$0xff]  ;;  %796 = vrot.lane.b32.xlu1 %v1516_v63, %s1366_s21  ;;  %814 = vrot.lane.b32.xlu2 %v1516_v63, %s1367_s17 }
 0x147   : > { %816 = vrot.lane.b32.xlu0 %v1518_v0, %s1367_s17 }
 0x14e   : > { %780 = vrot.lane.b32.xlu1 %v1518_v0, %s1368_s19  ;;  %798 = vrot.lane.b32.xlu2 %v1518_v0, %s1366_s21 }
 0x14f   : > { %778 = vrot.lane.b32.xlu0 %v1516_v63, %s1368_s19 }
 0x156   : > { %743 = vrot.lane.b32.xlu1 %v1516_v63, %s1361_s25  ;;  %760 = vrot.lane.b32.xlu2 %v1516_v63, %s1771_s22 }
 0x157   : > { %762 = vrot.lane.b32.xlu0 %v1518_v0, %s1771_s22 }
 0x15e   : > { %727 = vrot.lane.b32.xlu1 %v1518_v0, %s1767_s23  ;;  %745 = vrot.lane.b32.xlu2 %v1518_v0, %s1361_s25 }
 0x15f   : > { %725 = vrot.lane.b32.xlu0 %v1516_v63, %s1767_s23 }
 0x166   : > { %692 = vrot.lane.b32.xlu1 %v1516_v63, %s1363_s27  ;;  %708 = vrot.lane.b32.xlu2 %v1516_v63, %s1769_s26 }
 0x167   : > { %710 = vrot.lane.b32.xlu0 %v1518_v0, %s1769_s26 }
 0x16e   : > { %906 = vperm.xlu1 %1351, %v903_v1   ;;  %694 = vrot.lane.b32.xlu2 %v1518_v0, %s1363_s27  ;;  %v718_v1 = vperm.slane %v1304_v62, 1 }
 0x16f   : > { %898 = vperm.xlu0 %1350, %v895_v2   ;;  %v701_v2 = vperm.slane %v698_v61, 1 }
 0x1a0   : > { %v815_v3 = vpop.permute.xlu2 %814 }
 0x1a8   : > { %v799_v4 = vpop.permute.xlu2 %798 }
 0x1b0   : > { %v761_v16 = vpop.permute.xlu2 %760 }
 0x1b8   : > { %v797_v12 = vpop.permute.xlu1 %796  ;;  %v746_v33 = vpop.permute.xlu2 %745 }
 0x1b9   : > { %v817_v13 = vpop.permute.xlu0 %816  ;;  %v801_v14 = vsel %vm800_vm4, %v797_v12, %v799_v4  ;;  %v802_v15 = vsel %vm800_vm4, %v799_v4, %v797_v12 }
 0x1ba   : > { %v819_v17 = vsel %vm818_vm5, %v815_v3, %v817_v13  ;;  %v820_v18 = vsel %vm818_vm5, %v817_v13, %v815_v3  ;;  %v810_v19 = vmul.f32 %v806_v7, %v801_v14  ;;  %v811_v22 = vmul.f32 %v807_v10, %v802_v15  ;;  %v832_v15 = vld [vmem:[%s1758_s7] sm:$0xff] }
 0x1bb   : > { %v828_v20 = vmul.f32 %v824_v8, %v819_v17  ;;  %v829_v21 = vmul.f32 %v825_v9, %v820_v18  ;;  %v1112_v17 = vld.sshfl [vmem:[#allocation1 + $0x8] sm:$0xff pattern:$0x75316420] }
 0x1bd   : > { %862 = vmatpush.msra.mxu2 %v828_v20  ;;  %882 = vmatpush.msra.mxu3 %v829_v21 }
 0x1bf   : > { %863 = vmatpush.msra.mxu2 %v810_v19  ;;  %883 = vmatpush.msra.mxu3 %v811_v22 }
 0x1c0   : > { %v781_v26 = vpop.permute.xlu1 %780  ;;  %v709_v50 = vpop.permute.xlu2 %708 }
 0x1c1   : > { %v779_v27 = vpop.permute.xlu0 %778 }
 0x1c2   : > { %v783_v28 = vsel %vm782_vm6, %v779_v27, %v781_v26  ;;  %v784_v29 = vsel %vm782_vm6, %v781_v26, %v779_v27 }
 0x1c3   : > { %v792_v30 = vmul.f32 %v788_v24, %v783_v28  ;;  %v793_v31 = vmul.f32 %v789_v25, %v784_v29 }
 0x1c5   : > { %864 = vmatpush.msra.mxu2 %v792_v30  ;;  %884 = vmatpush.msra.mxu3 %v793_v31  ;;  %v1211_v30 = vld [vmem:[%s1764_s13] sm:$0xff] }
 0x1c8   : > { %v744_v39 = vpop.permute.xlu1 %743  ;;  %v695_v3 = vpop.permute.xlu2 %694 }
 0x1c9   : > { %v763_v40 = vpop.permute.xlu0 %762  ;;  %v747_v41 = vsel %vm541_vm1, %v744_v39, %v746_v33  ;;  %v748_v42 = vsel %vm541_vm1, %v746_v33, %v744_v39  ;;  %v1319_v33 = vld [vmem:[%s1765_s14 + $0x10] sm:$0x3]  ;;  %v1021_v39 = vperm.slane %v1318_v34, 0 }
 0x1ca   : > { %v765_v43 = vsel %vm764_vm7, %v761_v16, %v763_v40  ;;  %v766_v44 = vsel %vm764_vm7, %v763_v40, %v761_v16  ;;  %v756_v45 = vmul.f32 %v752_v35, %v748_v42  ;;  %v757_v48 = vmul.f32 %v753_v38, %v747_v41  ;;  %v1111_v16 = vld.sshfl [vmem:[#allocation1] sm:$0xff pattern:$0x75316420] }
 0x1cb   : > { %v774_v46 = vmul.f32 %v770_v36, %v765_v43  ;;  %v775_v47 = vmul.f32 %v771_v37, %v766_v44  ;;  %v1037_v35 = vperm.slane %v1319_v33, 0  ;;  %v1038_v36 = vperm.slane %v1319_v33, 1 }
 0x1cc   : > { %v1022_v40 = vperm.slane %v1318_v34, 1 }
 0x1cd   : > { %865 = vmatpush.msra.mxu2 %v774_v46  ;;  %885 = vmatpush.msra.mxu3 %v775_v47 }
 0x1cf   : > { %866 = vmatpush.msra.mxu2 %v1516_v63  ;;  %886 = vmatpush.msra.mxu3 %v1518_v0  ;;  %v700_v63 = vperm.slane %v698_v61, 0  ;;  %v717_v0 = vperm.slane %v1304_v62, 0  ;;  %v1316_v62 = vld [vmem:[%s1765_s14 + $0xa] sm:$0x3] }
 0x1d0   : > { %v728_v55 = vpop.permute.xlu1 %727 }
 0x1d1   : > { %v726_v56 = vpop.permute.xlu0 %725  ;;  %867 = vmatpush.msra.mxu2 %v756_v45  ;;  %887 = vmatpush.msra.mxu3 %v757_v48  ;;  %v1317_v48 = vld [vmem:[%s1765_s14 + $0xc] sm:$0x3] }
 0x1d2   : > { %v730_v57 = vsel %vm729_vm8, %v726_v56, %v728_v55  ;;  %v731_v58 = vsel %vm729_vm8, %v728_v55, %v726_v56 }
 0x1d3   : > { %v739_v59 = vmul.f32 %v735_v51, %v731_v58  ;;  %v740_v60 = vmul.f32 %v736_v53, %v730_v57  ;;  %v1005_v51 = vperm.slane %v1317_v48, 0  ;;  %v1006_v53 = vperm.slane %v1317_v48, 1  ;;  %v1108_v57 = vld [vmem:[%s1763_s12] sm:$0xff] }
 0x1d5   : > { %868 = vmatpush.msra.mxu2 %v739_v59  ;;  %888 = vmatpush.msra.mxu3 %v740_v60 }
 0x1d8   : > { %v693_v4 = vpop.permute.xlu1 %692 }
 0x1d9   : > { %v711_v5 = vpop.permute.xlu0 %710  ;;  %v696_v6 = vsel %vm575_vm2, %v693_v4, %v695_v3  ;;  %v697_v7 = vsel %vm575_vm2, %v695_v3, %v693_v4  ;;  %v1315_v3 = vld [vmem:[%s1765_s14 + $0x6] sm:$0x3] }
 0x1da   : > { %v712_v8 = vsel %vm561_vm0, %v709_v50, %v711_v5  ;;  %v713_v9 = vsel %vm561_vm0, %v711_v5, %v709_v50  ;;  %v704_v10 = vmul.f32 %v700_v63, %v697_v7  ;;  %v705_v14 = vmul.f32 %v701_v2, %v696_v6 }
 0x1db   : > { %v721_v12 = vmul.f32 %v717_v0, %v713_v9  ;;  %v722_v13 = vmul.f32 %v718_v1, %v712_v8  ;;  %v989_v0 = vperm.slane %v1316_v62, 0  ;;  %v990_v1 = vperm.slane %v1316_v62, 1 }
 0x1dc   : > { %v973_v9 = vperm.slane %v1315_v3, 0 }
 0x1dd   : > { %869 = vmatpush.msra.mxu2 %v721_v12  ;;  %889 = vmatpush.msra.mxu3 %v722_v13 }
 0x1df   : > { %870 = vmatpush.msra.mxu2 %v704_v10  ;;  %890 = vmatpush.msra.mxu3 %v705_v14  ;;  %v974_v10 = vperm.slane %v1315_v3, 1  ;;  %v1314_v14 = vld [vmem:[%s1765_s14 + $0x4] sm:$0x3] }
 0x1e0   : > { %1311 = vmatmul.msk.f32.vlgmr.msra.gmra.mxu2 %vm851_vm9, %v832_v15  ;;  %1312 = vmatmul.msk.f32.vlgmr.msra.gmra.mxu3 %vm851_vm9, %v832_v15  ;;  %v907_v23 = vpop.permute.xlu1 %906 }
 0x1e1   : > { %1322 = vmatpush.msk.msrb.mxu2 %vm1117_vm10, %v1111_v16  ;;  %1324 = vmatpush.msk.msrb.mxu3 %vm1117_vm10, %v1112_v17  ;;  %v899_v18 = vpop.permute.xlu0 %898 }
 0x1e8   : > { %1323 = vmatmul.msk.f32.vlgmr.msrb.gmra.mxu2 %vm1113_vm11, %v1108_v57  ;;  %1325 = vmatmul.msk.f32.vlgmr.msrb.gmra.mxu3 %vm1113_vm11, %v1108_v57 }
 0x263   : > { %v872_v19 = vpop.f32.mrf.mxu2  ;;  %v892_v20 = vpop.f32.mrf.mxu3 }
 0x264   : > { %v901_v21 = vmul.f32 %v899_v18, %v872_v19  ;;  %v902_v22 = vmul.f32 %v899_v18, %v892_v20  ;;  %v957_v18 = vperm.slane %v1314_v14, 0  ;;  %v958_v19 = vperm.slane %v1314_v14, 1 }
 0x266   : > { %v909_v24 = vadd.f32 %v907_v23, %v901_v21  ;;  %v910_v25 = vadd.f32 %v907_v23, %v902_v22 }
 0x268   : > { %v911_v26 = vmul.f32 0.01, %v909_v24  ;;  %v912_v27 = vmul.f32 0.01, %v910_v25 }
 0x26a   : > { %v1628_v28 = vmax.f32 %v909_v24, %v911_v26  ;;  %v1630_v29 = vmax.f32 %v910_v25, %v912_v27  ;;  %v1313_v26 = vld [vmem:[%s1765_s14 + $0x2] sm:$0x3]  ;;  %v923_v27 = vld [vmem:[%s1765_s14] sm:$0x3] }
 0x26b   : > { %v925_v33 = vperm.slane %v923_v27, 0  ;;  %v926_v34 = vperm.slane %v923_v27, 1 }
 0x26c   : > { %1013 = vrot.lane.b32.xlu1 %v1628_v28, %s1366_s21  ;;  %1029 = vrot.lane.b32.xlu2 %v1628_v28, %s1367_s17 }
 0x26d   : > { %1031 = vrot.lane.b32.xlu0 %v1630_v29, %s1367_s17 }
 0x274   : > { %999 = vrot.lane.b32.xlu1 %v1630_v29, %s1368_s19  ;;  %1015 = vrot.lane.b32.xlu2 %v1630_v29, %s1366_s21  ;;  %s1775_s21 = smov 16  }
 0x275   : > { %997 = vrot.lane.b32.xlu0 %v1628_v28, %s1368_s19 }
 0x27c   : > { %965 = vrot.lane.b32.xlu1 %v1628_v28, %s1361_s25  ;;  %981 = vrot.lane.b32.xlu2 %v1628_v28, %s1773_s30 }
 0x27d   : > { %983 = vrot.lane.b32.xlu0 %v1630_v29, %s1773_s30 }
 0x284   : > { %951 = vrot.lane.b32.xlu1 %v1630_v29, %s1774_s16  ;;  %967 = vrot.lane.b32.xlu2 %v1630_v29, %s1361_s25 }
 0x285   : > { %949 = vrot.lane.b32.xlu0 %v1628_v28, %s1774_s16  ;;  %s1301_s16 = sshll.u32 %s1777_s20, 3 }
 0x286   : > { %s518_s19 = scalar_lea.vmem %s1766_s15, %s1301_s16 }
 0x28c   : > { %917 = vrot.lane.b32.xlu1 %v1628_v28, %s1363_s27  ;;  %933 = vrot.lane.b32.xlu2 %v1628_v28, %s1775_s21 }
 0x28d   : > { %935 = vrot.lane.b32.xlu0 %v1630_v29, %s1775_s21 }
 0x294   : > { %919 = vrot.lane.b32.xlu2 %v1630_v29, %s1363_s27 }
 0x295   : > { %1214 = vperm.xlu0 %1350, %v1211_v30  }
 0x2c6   : > { %v1030_v31 = vpop.permute.xlu2 %1029 }
 0x2ce   : > { %v1016_v32 = vpop.permute.xlu2 %1015 }
 0x2d6   : > { %v982_v45 = vpop.permute.xlu2 %981 }
 0x2de   : > { %v1014_v37 = vpop.permute.xlu1 %1013  ;;  %v968_v63 = vpop.permute.xlu2 %967 }
 0x2df   : > { %v1032_v38 = vpop.permute.xlu0 %1031  ;;  %v1017_v41 = vsel %vm800_vm4, %v1014_v37, %v1016_v32  ;;  %v1018_v42 = vsel %vm800_vm4, %v1016_v32, %v1014_v37 }
 0x2e0   : > { %v1033_v43 = vsel %vm818_vm5, %v1030_v31, %v1032_v38  ;;  %v1034_v44 = vsel %vm818_vm5, %v1032_v38, %v1030_v31  ;;  %v1025_v49 = vmul.f32 %v1021_v39, %v1017_v41  ;;  %v1026_v50 = vmul.f32 %v1022_v40, %v1018_v42 }
 0x2e1   : > { %v1041_v46 = vmul.f32 %v1037_v35, %v1033_v43  ;;  %v1042_v47 = vmul.f32 %v1038_v36, %v1034_v44  ;;  %v1045_v43 = vld [vmem:[%s1761_s10] sm:$0xff] }
 0x2e3   : > { %1074 = vmatpush.msrb.mxu0 %v1041_v46  ;;  %1094 = vmatpush.msrb.mxu1 %v1042_v47  ;;  %v1139_v46 = vpop.f32.mrf.mxu2  ;;  %v1159_v47 = vpop.f32.mrf.mxu3 }
 0x2e5   : > { %1075 = vmatpush.msrb.mxu0 %v1025_v49  ;;  %1095 = vmatpush.msrb.mxu1 %v1026_v50 }
 0x2e6   : > { %v1000_v55 = vpop.permute.xlu1 %999  ;;  %v934_v15 = vpop.permute.xlu2 %933 }
 0x2e7   : > { %v998_v56 = vpop.permute.xlu0 %997 }
 0x2e8   : > { %v1001_v58 = vsel %vm782_vm6, %v998_v56, %v1000_v55  ;;  %v1002_v59 = vsel %vm782_vm6, %v1000_v55, %v998_v56 }
 0x2e9   : > { %v1009_v60 = vmul.f32 %v1005_v51, %v1001_v58  ;;  %v1010_v61 = vmul.f32 %v1006_v53, %v1002_v59 }
 0x2eb   : > { %1076 = vmatpush.msrb.mxu0 %v1009_v60  ;;  %1096 = vmatpush.msrb.mxu1 %v1010_v61 }
 0x2ee   : > { %v966_v2 = vpop.permute.xlu1 %965  ;;  %v920_v31 = vpop.permute.xlu2 %919 }
 0x2ef   : > { %v984_v4 = vpop.permute.xlu0 %983  ;;  %v969_v12 = vsel %vm541_vm1, %v966_v2, %v968_v63  ;;  %v970_v13 = vsel %vm541_vm1, %v968_v63, %v966_v2 }
 0x2f0   : > { %v985_v5 = vsel %vm764_vm7, %v982_v45, %v984_v4  ;;  %v986_v6 = vsel %vm764_vm7, %v984_v4, %v982_v45  ;;  %v977_v16 = vmul.f32 %v973_v9, %v970_v13  ;;  %v978_v17 = vmul.f32 %v974_v10, %v969_v12 }
 0x2f1   : > { %v993_v7 = vmul.f32 %v989_v0, %v985_v5  ;;  %v994_v8 = vmul.f32 %v990_v1, %v986_v6 }
 0x2f3   : > { %1077 = vmatpush.msrb.mxu0 %v993_v7  ;;  %1097 = vmatpush.msrb.mxu1 %v994_v8 }
 0x2f5   : > { %1078 = vmatpush.msrb.mxu0 %v1628_v28  ;;  %1098 = vmatpush.msrb.mxu1 %v1630_v29  ;;  %v941_v28 = vperm.slane %v1313_v26, 0  ;;  %v942_v29 = vperm.slane %v1313_v26, 1 }
 0x2f6   : > { %v952_v20 = vpop.permute.xlu1 %951 }
 0x2f7   : > { %1079 = vmatpush.msrb.mxu0 %v977_v16  ;;  %1099 = vmatpush.msrb.mxu1 %v978_v17  ;;  %v950_v21 = vpop.permute.xlu0 %949 }
 0x2f8   : > { %v953_v22 = vsel %vm729_vm8, %v950_v21, %v952_v20  ;;  %v954_v23 = vsel %vm729_vm8, %v952_v20, %v950_v21 }
 0x2f9   : > { %v961_v24 = vmul.f32 %v957_v18, %v954_v23  ;;  %v962_v25 = vmul.f32 %v958_v19, %v953_v22 }
 0x2fb   : > { %1080 = vmatpush.msrb.mxu0 %v961_v24  ;;  %1100 = vmatpush.msrb.mxu1 %v962_v25 }
 0x2fe   : > { %v918_v30 = vpop.permute.xlu1 %917 }
 0x2ff   : > { %v936_v32 = vpop.permute.xlu0 %935  ;;  %v921_v35 = vsel %vm575_vm2, %v918_v30, %v920_v31  ;;  %v922_v36 = vsel %vm575_vm2, %v920_v31, %v918_v30 }
 0x300   : > { %v937_v37 = vsel %vm561_vm0, %v934_v15, %v936_v32  ;;  %v938_v38 = vsel %vm561_vm0, %v936_v32, %v934_v15  ;;  %v929_v41 = vmul.f32 %v925_v33, %v922_v36  ;;  %v930_v42 = vmul.f32 %v926_v34, %v921_v35 }
 0x301   : > { %v945_v39 = vmul.f32 %v941_v28, %v938_v38  ;;  %v946_v40 = vmul.f32 %v942_v29, %v937_v37 }
 0x303   : > { %1081 = vmatpush.msrb.mxu0 %v945_v39  ;;  %1101 = vmatpush.msrb.mxu1 %v946_v40 }
 0x305   : > { %1082 = vmatpush.msrb.mxu0 %v929_v41  ;;  %1102 = vmatpush.msrb.mxu1 %v930_v42 }
 0x306   : > { %1320 = vmatmul.msk.f32.vlgmr.msrb.gmra.mxu0 %vm851_vm9, %v1045_v43  ;;  %1321 = vmatmul.msk.f32.vlgmr.msrb.gmra.mxu1 %vm851_vm9, %v1045_v43 }
 0x307   : > { %1326 = vmatpush.msk.msra.mxu0 %vm1117_vm10, %v1510_v52  ;;  %1328 = vmatpush.msk.msra.mxu1 %vm1117_vm10, %v1513_v54  ;;  %v1215_v51 = vpop.permute.xlu0 %1214 }
 0x30e   : > { %1327 = vmatmul.msk.f32.vlgmr.msra.gmra.mxu0 %vm1113_vm11, %v1107_v11  ;;  %1329 = vmatmul.msk.f32.vlgmr.msra.gmra.mxu1 %vm1113_vm11, %v1107_v11 }
 0x383   : > { %v1084_v44 = vpop.f32.mrf.mxu0  ;;  %v1104_v45 = vpop.f32.mrf.mxu1 }
 0x38b   : > { %v1188_v48 = vpop.f32.mrf.mxu0  ;;  %v1208_v49 = vpop.f32.mrf.mxu1 }
 0x38c   : > { %v1189_v50 = vadd.f32 %v1188_v48, %v1139_v46  ;;  %v1209_v52 = vadd.f32 %v1208_v49, %v1159_v47 }
 0x38e   : > { %v1217_v53 = vadd.f32 %v1215_v51, %v1189_v50  ;;  %v1218_v54 = vadd.f32 %v1215_v51, %v1209_v52 }
 0x390   : > { %v1219_v55 = vadd.f32 %v1217_v53, %v1084_v44  ;;  %v1220_v56 = vadd.f32 %v1218_v54, %v1104_v45 }
 0x392   : > { %1221 = vst [vmem:[%s518_s19] sm:$0xff] %v1219_v55 }
 0x393   : > { %1222 = vst [vmem:[%s518_s19 + $0x8] sm:$0xff] %v1220_v56 }
 0x394 PF: > { %s25_s18 = sadd.s32 1, %s1359_s18  }
 0x395   : > { %p22_p4 = scmp.ge.s32.totalorder %s25_s18, 4  }
 0x397   :  { %24 = sbr.rel (!%p22_p4) target bundleno = 1 (0x1), region = 121 }

</bundles_post_ra>
